<compile_context>
chip_gen: v5e
topology: v5e:2x2
jax: 0.10.0
libtpu: 0.0.40
codegen_flags: <defaults>
</compile_context>

<pallas_src>
import jax
import jax.numpy as jnp
from jax.experimental import pallas as pl
from jax.experimental.pallas import tpu as pltpu


_VMEM_LIMIT_BYTES = 64 * 1024 * 1024   # explicit scoped-VMEM cap (safe on v5e/v6e/v7x)
_VMEM_TILE_BUDGET = 32 * 1024 * 1024   # keep resident buffers well under the cap


def _round_up(x, m):
    return ((x + m - 1) // m) * m


def _decoder_kernel(x_ref, w1_ref, b1_ref, w2_ref, b2_ref, o_ref):
    """Per-pixel MLP: y = relu(x @ W1 + b1) @ W2 + b2 (two 1x1 convs).

    x_ref: (tile_m, V) bf16, w1: (V, Hd) bf16, w2: (Hd, Cout_pad) bf16,
    biases f32, output f32 (lane-dense Cout_pad = multiple of 128).
    """
    h = jnp.dot(x_ref[...], w1_ref[...], preferred_element_type=jnp.float32)
    h = jnp.maximum(h + b1_ref[...], 0.0)                      # (tile_m, Hd) f32
    y = jnp.dot(h.astype(jnp.bfloat16), w2_ref[...],
                preferred_element_type=jnp.float32)            # (tile_m, Cout_pad)
    o_ref[...] = y + b2_ref[...]


def _pick_tile_m(M, V, Hd, Cout_pad):
    """Largest row tile (multiple of 16, <= padded M, <= 1024) fitting the
    double-buffered activation/output tiles + weights in the VMEM budget."""
    tile = min(1024, _round_up(M, 16))
    tile = max(16, _round_up(tile, 16))

    def vmem_bytes(t):
        act = 2 * t * V * 2                 # bf16 activations, double-buffered
        out = 2 * t * Cout_pad * 4          # f32 output, double-buffered
        wgt = 2 * (V * Hd * 2 + Hd * Cout_pad * 2 + Hd * 4 + Cout_pad * 4)
        return act + out + wgt

    while tile > 16 and vmem_bytes(tile) > _VMEM_TILE_BUDGET:
        tile = max(16, _round_up(tile // 2, 16))
    return tile


def _run_decoder_mlp(x_flat, w1, b1, w2, b2, *, tile_m):
    """x_flat: (M_pad, V) bf16 -> (M_pad, Cout_pad) f32, tiled over rows."""
    M, V = x_flat.shape
    Hd = w1.shape[1]
    Cout_pad = w2.shape[1]
    assert M % tile_m == 0  # wrapper pads M to a tile multiple

    return pl.pallas_call(
        _decoder_kernel,
        out_shape=jax.ShapeDtypeStruct((M, Cout_pad), jnp.float32),
        grid_spec=pltpu.PrefetchScalarGridSpec(
            num_scalar_prefetch=0,
            grid=(M // tile_m,),
            in_specs=[
                pl.BlockSpec((tile_m, V), lambda i: (i, 0)),    # activations
                pl.BlockSpec((V, Hd), lambda i: (0, 0)),        # W1 (resident)
                pl.BlockSpec((1, Hd), lambda i: (0, 0)),        # b1
                pl.BlockSpec((Hd, Cout_pad), lambda i: (0, 0)),  # W2 (resident)
                pl.BlockSpec((1, Cout_pad), lambda i: (0, 0)),   # b2
            ],
            out_specs=pl.BlockSpec((tile_m, Cout_pad), lambda i: (i, 0)),
        ),
        compiler_params=pltpu.CompilerParams(
            dimension_semantics=("parallel",),
            vmem_limit_bytes=_VMEM_LIMIT_BYTES),
    )(x_flat, w1, b1, w2, b2)


class DalleVAEPallas:
    """JAX/Pallas re-implementation of Dalle_VAE.forward (no_process=False)."""

    IMG_CHANNELS = 3
    UPSAMPLE = 8  # image_size // 8 spatial tokens -> image_size pixels

    def __init__(self, image_size, vocab_size, hidden_dim, key):
        self.image_size = image_size
        self.vocab_size = vocab_size
        self.hidden_dim = hidden_dim
        self.cout = self.IMG_CHANNELS * self.UPSAMPLE * self.UPSAMPLE      # 192
        self.cout_pad = _round_up(self.cout, 128)                          # 256

        k1, k2, k3, k4 = jax.random.split(key, 4)
        # Deterministic synthetic decoder weights (1x1 convs as matmuls),
        # converted to bf16 once here (not per call).
        w1 = (jax.random.normal(k1, (vocab_size, hidden_dim), jnp.float32)
              * (1.0 / jnp.sqrt(vocab_size)))
        b1 = jax.random.normal(k2, (1, hidden_dim), jnp.float32) * 0.01
        w2 = (jax.random.normal(k3, (hidden_dim, self.cout), jnp.float32)
              * (1.0 / jnp.sqrt(hidden_dim)))
        b2 = jax.random.normal(k4, (1, self.cout), jnp.float32) * 0.01

        pad = self.cout_pad - self.cout
        self.w1 = w1.astype(jnp.bfloat16)
        self.b1 = b1                                                # f32
        self.w2 = jnp.pad(w2, ((0, 0), (0, pad))).astype(jnp.bfloat16)
        self.b2 = jnp.pad(b2, ((0, 0), (0, pad)))                   # f32

    def forward(self, img_seq_prob):
        """img_seq_prob: (bsz, seq_len, num_class) float.

        Returns decoded image in NCHW: (bsz, 3, image_size, image_size), f32.
        """
        bsz, seq_len, num_class = img_seq_prob.shape
        h8 = self.image_size // 8
        assert seq_len == h8 * h8
        assert num_class == self.vocab_size

        # view(bsz, H/8, W/8, vocab) then permute(0,3,1,2) -> NCHW.  A 1x1
        # conv over channels is a per-pixel matmul, so flatten pixels and run
        # channels-last; bf16 activations halve HBM traffic into the kernel.
        M = bsz * h8 * h8
        x_flat = img_seq_prob.reshape(M, num_class).astype(jnp.bfloat16)

        tile_m = _pick_tile_m(M, num_class, self.hidden_dim, self.cout_pad)
        M_pad = _round_up(M, tile_m)
        if M_pad != M:
            x_flat = jnp.pad(x_flat, ((0, M_pad - M), (0, 0)))

        y = _run_decoder_mlp(x_flat, self.w1, self.b1, self.w2, self.b2,
                             tile_m=tile_m)                 # (M_pad, 256) f32
        y = y[:M, :self.cout]                               # drop row/lane pad

        # depth-to-space by 8: (B,H8,W8,3,8,8) -> NCHW (B,3,H,W)
        up = self.UPSAMPLE
        y = y.reshape(bsz, h8, h8, self.IMG_CHANNELS, up, up)
        y = jnp.transpose(y, (0, 3, 1, 4, 2, 5))
        y = y.reshape(bsz, self.IMG_CHANNELS, h8 * up, h8 * up)
        return y.astype(jnp.float32)   # matches trailing .float()


if __name__ == "__main__":
    image_size = 32          # -> 4x4 = 16 tokens
    vocab_size = 128
    hidden_dim = 128
    bsz = 2
    seq_len = (image_size // 8) ** 2

    key = jax.random.PRNGKey(0)
    k_model, k_in = jax.random.split(key)

    model = DalleVAEPallas(image_size, vocab_size, hidden_dim, k_model)

    # img_seq_prob: per-token probabilities over the codebook (softmaxed).
    logits = jax.random.normal(k_in, (bsz, seq_len, vocab_size), jnp.float32)
    img_seq_prob = jax.nn.softmax(logits, axis=-1)

    out = model.forward(img_seq_prob)
    jax.block_until_ready(out)

    assert out.shape == (bsz, 3, image_size, image_size), out.shape
    assert out.dtype == jnp.float32
    print("KERNEL_OK")
</pallas_src>

<mosaic_0001>
module attributes {stable_mosaic.version = 11 : i64} {
  func.func @_decoder_kernel(%arg0: i32, %arg1: memref<32x128xbf16, #tpu.memory_space<vmem>>, %arg2: memref<128x128xbf16, #tpu.memory_space<vmem>>, %arg3: memref<1x128xf32, #tpu.memory_space<vmem>>, %arg4: memref<128x256xbf16, #tpu.memory_space<vmem>>, %arg5: memref<1x256xf32, #tpu.memory_space<vmem>>, %arg6: memref<32x256xf32, #tpu.memory_space<vmem>>) attributes {dimension_semantics = [#tpu.dimension_semantics<parallel>], iteration_bounds = array<i64: 1>, scalar_prefetch = 0 : i64, scratch_operands = 0 : i64, tpu.core_type = #tpu.core_type<tc>, window_params = [{transform_indices = @transform_0, window_bounds = array<i64: 32, 128>}, {pipeline_mode = #tpu.pipeline_mode<synchronous>, transform_indices = @transform_1, window_bounds = array<i64: 128, 128>}, {pipeline_mode = #tpu.pipeline_mode<synchronous>, transform_indices = @transform_2, window_bounds = array<i64: 1, 128>}, {pipeline_mode = #tpu.pipeline_mode<synchronous>, transform_indices = @transform_3, window_bounds = array<i64: 128, 256>}, {pipeline_mode = #tpu.pipeline_mode<synchronous>, transform_indices = @transform_4, window_bounds = array<i64: 1, 256>}, {transform_indices = @transform_5, window_bounds = array<i64: 32, 256>}]} {
    %c0 = arith.constant 0 : index
    %c0_0 = arith.constant 0 : index
    %0 = vector.load %arg1[%c0, %c0_0] : memref<32x128xbf16, #tpu.memory_space<vmem>>, vector<32x128xbf16>
    %c0_1 = arith.constant 0 : index
    %c0_2 = arith.constant 0 : index
    %1 = vector.load %arg2[%c0_1, %c0_2] : memref<128x128xbf16, #tpu.memory_space<vmem>>, vector<128x128xbf16>
    %cst = arith.constant dense<0.000000e+00> : vector<32x128xf32>
    %2 = tpu.matmul %0, %1, %cst {dimension_numbers = #tpu.dot_dimension_numbers<[1], [0], [0], [1], [0, 0, 1, 1], [], []>} : vector<32x128xbf16>, vector<128x128xbf16>, vector<32x128xf32> -> vector<32x128xf32>
    %c0_3 = arith.constant 0 : index
    %c0_4 = arith.constant 0 : index
    %3 = vector.load %arg3[%c0_3, %c0_4] : memref<1x128xf32, #tpu.memory_space<vmem>>, vector<1x128xf32>
    %4 = vector.broadcast %3 : vector<1x128xf32> to vector<32x128xf32>
    %5 = arith.addf %2, %4 : vector<32x128xf32>
    %cst_5 = arith.constant 0.000000e+00 : f32
    %6 = vector.broadcast %cst_5 : f32 to vector<32x128xf32>
    %7 = arith.maximumf %5, %6 : vector<32x128xf32>
    %8 = arith.truncf %7 : vector<32x128xf32> to vector<32x128xbf16>
    %c0_6 = arith.constant 0 : index
    %c0_7 = arith.constant 0 : index
    %9 = vector.load %arg4[%c0_6, %c0_7] : memref<128x256xbf16, #tpu.memory_space<vmem>>, vector<128x256xbf16>
    %cst_8 = arith.constant dense<0.000000e+00> : vector<32x256xf32>
    %10 = tpu.matmul %8, %9, %cst_8 {dimension_numbers = #tpu.dot_dimension_numbers<[1], [0], [0], [1], [0, 0, 1, 1], [], []>} : vector<32x128xbf16>, vector<128x256xbf16>, vector<32x256xf32> -> vector<32x256xf32>
    %c0_9 = arith.constant 0 : index
    %c0_10 = arith.constant 0 : index
    %11 = vector.load %arg5[%c0_9, %c0_10] : memref<1x256xf32, #tpu.memory_space<vmem>>, vector<1x256xf32>
    %12 = vector.broadcast %11 : vector<1x256xf32> to vector<32x256xf32>
    %13 = arith.addf %10, %12 : vector<32x256xf32>
    %c0_11 = arith.constant 0 : index
    %c0_12 = arith.constant 0 : index
    %14 = vector.load %arg6[%c0_11, %c0_12] : memref<32x256xf32, #tpu.memory_space<vmem>>, vector<32x256xf32>
    tpu.vector_store %arg6[%c0_11, %c0_12], %13 {strides = array<i32>} : memref<32x256xf32, #tpu.memory_space<vmem>>, vector<32x256xf32>,
    return
  }
  func.func @transform_0(%arg0: i32) -> (i32, i32) {
    %c0_i32 = arith.constant 0 : i32
    %c0_i32_0 = arith.constant 0 : i32
    return %arg0, %c0_i32 : i32, i32
  }
  func.func @transform_1(%arg0: i32) -> (i32, i32) {
    %c0_i32 = arith.constant 0 : i32
    %c0_i32_0 = arith.constant 0 : i32
    %c0_i32_1 = arith.constant 0 : i32
    return %c0_i32, %c0_i32_0 : i32, i32
  }
  func.func @transform_2(%arg0: i32) -> (i32, i32) {
    %c0_i32 = arith.constant 0 : i32
    %c0_i32_0 = arith.constant 0 : i32
    %c0_i32_1 = arith.constant 0 : i32
    return %c0_i32, %c0_i32_0 : i32, i32
  }
  func.func @transform_3(%arg0: i32) -> (i32, i32) {
    %c0_i32 = arith.constant 0 : i32
    %c0_i32_0 = arith.constant 0 : i32
    %c0_i32_1 = arith.constant 0 : i32
    return %c0_i32, %c0_i32_0 : i32, i32
  }
  func.func @transform_4(%arg0: i32) -> (i32, i32) {
    %c0_i32 = arith.constant 0 : i32
    %c0_i32_0 = arith.constant 0 : i32
    %c0_i32_1 = arith.constant 0 : i32
    return %c0_i32, %c0_i32_0 : i32, i32
  }
  func.func @transform_5(%arg0: i32) -> (i32, i32) {
    %c0_i32 = arith.constant 0 : i32
    %c0_i32_0 = arith.constant 0 : i32
    return %arg0, %c0_i32 : i32, i32
  }
}

</mosaic_0001>

<bundles_post_ra>
// kernel: tpu_custom_call.1
= control target key start
LH: loop header
LB: loop body
LE: loop exit
PB: predicated region body
PF: predicated region fallthrough
CT: control target
= control target key end

     0   :  { %10 = vsyncpa [#allocation3], 0  ;;  %s654_s0 = inlined_call_operand.hbm [shape: bf16[32,128], index: 0, kind: input, shape index: {}]   ;;  %s655_s1 = inlined_call_operand.hbm [shape: bf16[128,128], index: 1, kind: input, shape index: {}]   ;;  %s656_s2 = inlined_call_operand.vmem [shape: f32[1,128], index: 2, kind: input, shape index: {}]   ;;  %s657_s3 = inlined_call_operand.hbm [shape: bf16[128,256], index: 3, kind: input, shape index: {}]   ;;  %s658_s4 = inlined_call_operand.vmem [shape: f32[1,256], index: 4, kind: input, shape index: {}]   ;;  %s659_s5 = inlined_call_operand.hbm [shape: f32[32,256], index: 5, kind: output, shape index: {}]  }
   0x1   :  { %11 = vsyncpa [#allocation6], 0 }
   0x2   :  { %12 = vsyncpa [#allocation4], 0  ;;  %s30_s20 = sshll.u32 %s655_s1, 4  ;;  %s596_s21 = smov [#allocation5]   ;;  %s31_s20 = int_to_ptr.hbm [resolvable:$true] %s30_s20 }
   0x3   :  { %s32_s22 = sshll.u32 %s596_s21, 4  ;;  %s17_s25 = sshll.u32 %s654_s0, 4  ;;  %s33_s22 = int_to_ptr.vmem [resolvable:$true] %s32_s22  ;;  %s18_s25 = int_to_ptr.hbm [resolvable:$true] %s17_s25 }
   0x4   :  { %s597_s26 = smov 64   ;;  %s598_s27 = smov 4  }
   0x5   :  { %38 = dma.hbm_to_vmem [thread:$0]  %s31_s20, 1024, %s33_s22, [#allocation6], %s597_s26, %s597_s26, %s598_s27  }
   0x6   :  { %s599_s28 = smov [#allocation2]   ;;  %s45_s7 = sshll.u32 %s657_s3, 4  ;;  %s46_s7 = int_to_ptr.hbm [resolvable:$true] %s45_s7 }
   0x7   :  { %s19_s29 = sshll.u32 %s599_s28, 4  ;;  %s600_s1 = smov [#allocation7]   ;;  %s20_s29 = int_to_ptr.vmem [resolvable:$true] %s19_s29 }
   0x8   :  { %25 = dma.hbm_to_vmem [thread:$0]  %s18_s25, 256, %s20_s29, [#allocation3], %s597_s26, %s597_s26, %s598_s27  }
   0x9   :  { %s47_s8 = sshll.u32 %s600_s1, 4  ;;  %s601_s9 = smov 128   ;;  %s48_s8 = int_to_ptr.vmem [resolvable:$true] %s47_s8 }
   0xa   :  { %s602_s10 = smov 8  }
   0xb   :  { %53 = dma.hbm_to_vmem [thread:$0]  %s46_s7, 2048, %s48_s8, [#allocation6], %s601_s9, %s601_s9, %s602_s10  }
   0xc   :  { %590 = dma.done.wait [#allocation3], 256  }
   0xd   :  { %591 = vsyncadd [#allocation3], 4294967040 }
   0xe   :  { %592 = dma.done.wait [#allocation6], 3072  }
   0xf   :  { %593 = vsyncadd [#allocation6], 4294964224  ;;  %v458_v0 = vld [vmem:[#allocation5 + $0x38] sm:$0xff]  ;;  %v457_v1 = vld [vmem:[#allocation5 + $0x30] sm:$0xff]  ;;  %s331_s15 = sshll.u32 %s659_s5, 4  ;;  %s604_s16 = smov 256   ;;  %s332_s15 = int_to_ptr.hbm [resolvable:$true] %s331_s15 }
  0x10   :  { %152 = vmatpush.bf16.msra.mxu0 %v458_v0  ;;  %475 = vmatpush.bf16.msra.mxu3 %v458_v0  ;;  %v443_v2 = vld [vmem:[#allocation7 + $0x70] sm:$0xf]  ;;  %v474_v3 = vld [vmem:[#allocation7 + $0x74] sm:$0xf0]  ;;  %v473_v5 = vld [vmem:[#allocation7 + $0x74] sm:$0xf] }
  0x11   :  { %v444_v4 = vor.u32 %v474_v3, %v443_v2  ;;  %v445_v6 = vld [vmem:[#allocation7 + $0x78] sm:$0xf0]  ;;  %v435_v7 = vld [vmem:[#allocation7 + $0x60] sm:$0xf]  ;;  %v472_v9 = vld [vmem:[#allocation7 + $0x64] sm:$0xf0] }
  0x12   :  { %v448_v8 = vor.u32 %v473_v5, %v445_v6  ;;  %v471_v10 = vld [vmem:[#allocation7 + $0x64] sm:$0xf]  ;;  %v437_v11 = vld [vmem:[#allocation7 + $0x68] sm:$0xf0]  ;;  %v436_v13 = vor.u32 %v472_v9, %v435_v7  ;;  %v427_v15 = vld [vmem:[#allocation7 + $0x50] sm:$0xf] }
  0x13   :  { %v456_v12 = vld [vmem:[#allocation5 + $0x28] sm:$0xff]  ;;  %279 = vmatpush.bf16.msra.mxu1 %v444_v4  ;;  %v440_v14 = vor.u32 %v471_v10, %v437_v11  ;;  %v470_v16 = vld [vmem:[#allocation7 + $0x54] sm:$0xf0]  ;;  %v469_v17 = vld [vmem:[#allocation7 + $0x54] sm:$0xf]  ;;  %s605_s17 = smov 16  }
  0x14   :  { %153 = vmatpush.bf16.msra.mxu0 %v457_v1  ;;  %476 = vmatpush.bf16.msra.mxu3 %v457_v1  ;;  %v429_v18 = vld [vmem:[#allocation7 + $0x58] sm:$0xf0]  ;;  %v455_v19 = vld [vmem:[#allocation5 + $0x20] sm:$0xff]  ;;  %v428_v20 = vor.u32 %v470_v16, %v427_v15  ;;  %v468_v23 = vld [vmem:[#allocation7 + $0x44] sm:$0xf0] }
  0x15   :  { %298 = vmatpush.bf16.msra.mxu2 %v448_v8  ;;  %v432_v21 = vor.u32 %v469_v17, %v429_v18  ;;  %v419_v22 = vld [vmem:[#allocation7 + $0x40] sm:$0xf]  ;;  %v467_v24 = vld [vmem:[#allocation7 + $0x44] sm:$0xf]  ;;  %v421_v25 = vld [vmem:[#allocation7 + $0x48] sm:$0xf0] }
  0x16   :  { %v454_v26 = vld [vmem:[#allocation5 + $0x18] sm:$0xff]  ;;  %v420_v27 = vor.u32 %v468_v23, %v419_v22  ;;  %v424_v28 = vor.u32 %v467_v24, %v421_v25  ;;  %v453_v29 = vld [vmem:[#allocation5 + $0x10] sm:$0xff]  ;;  %v452_v30 = vld [vmem:[#allocation5 + $0x8] sm:$0xff] }
  0x17   :  { %280 = vmatpush.bf16.msra.mxu1 %v436_v13  ;;  %v451_v31 = vld [vmem:[#allocation5] sm:$0xff]  ;;  %v449_v32 = vld [vmem:[#allocation2] sm:$0xff]  ;;  %v450_v33 = vld [vmem:[#allocation2 + $0x8] sm:$0xff] }
  0x18   :  { %154 = vmatpush.bf16.msra.mxu0 %v456_v12  ;;  %477 = vmatpush.bf16.msra.mxu3 %v456_v12  ;;  %v411_v34 = vld [vmem:[#allocation7 + $0x30] sm:$0xf]  ;;  %v466_v35 = vld [vmem:[#allocation7 + $0x34] sm:$0xf0]  ;;  %v465_v36 = vld [vmem:[#allocation7 + $0x34] sm:$0xf] }
  0x19   :  { %299 = vmatpush.bf16.msra.mxu2 %v440_v14  ;;  %v412_v37 = vor.u32 %v466_v35, %v411_v34  ;;  %v413_v38 = vld [vmem:[#allocation7 + $0x38] sm:$0xf0]  ;;  %v403_v40 = vld [vmem:[#allocation7 + $0x20] sm:$0xf]  ;;  %v464_v41 = vld [vmem:[#allocation7 + $0x24] sm:$0xf0] }
  0x1a   :  { %v416_v39 = vor.u32 %v465_v36, %v413_v38  ;;  %v463_v42 = vld [vmem:[#allocation7 + $0x24] sm:$0xf]  ;;  %v404_v43 = vor.u32 %v464_v41, %v403_v40  ;;  %v405_v44 = vld [vmem:[#allocation7 + $0x28] sm:$0xf0]  ;;  %v395_v46 = vld [vmem:[#allocation7 + $0x10] sm:$0xf] }
  0x1b   :  { %281 = vmatpush.bf16.msra.mxu1 %v428_v20  ;;  %v408_v45 = vor.u32 %v463_v42, %v405_v44  ;;  %v462_v47 = vld [vmem:[#allocation7 + $0x14] sm:$0xf0]  ;;  %v461_v48 = vld [vmem:[#allocation7 + $0x14] sm:$0xf]  ;;  %v397_v50 = vld [vmem:[#allocation7 + $0x18] sm:$0xf0] }
  0x1c   :  { %155 = vmatpush.bf16.msra.mxu0 %v455_v19  ;;  %478 = vmatpush.bf16.msra.mxu3 %v455_v19  ;;  %v396_v49 = vor.u32 %v462_v47, %v395_v46  ;;  %v400_v51 = vor.u32 %v461_v48, %v397_v50  ;;  %v387_v52 = vld [vmem:[#allocation7] sm:$0xf]  ;;  %v460_v53 = vld [vmem:[#allocation7 + $0x4] sm:$0xf0]  ;;  %v459_v54 = vld [vmem:[#allocation7 + $0x4] sm:$0xf] }
  0x1d   :  { %300 = vmatpush.bf16.msra.mxu2 %v432_v21  ;;  %v388_v55 = vor.u32 %v460_v53, %v387_v52  ;;  %v389_v56 = vld [vmem:[#allocation7 + $0x8] sm:$0xf0]  ;;  %v493_v59 = vld [vmem:[%s656_s2] ss:$0 sm:$0xff]  ;;  %s603_s2 = smov [#allocation8]  }
  0x1e   :  { %v392_v57 = vor.u32 %v459_v54, %v389_v56  ;;  %v193_v9 = vld [vmem:[%s658_s4] sm:$0x3]  ;;  %s329_s4 = sshll.u32 %s603_s2, 4  ;;  %s330_s4 = int_to_ptr.vmem [resolvable:$true] %s329_s4 }
  0x1f   :  { %282 = vmatpush.bf16.msra.mxu1 %v420_v27  ;;  %v195_v10 = vperm.slane %v193_v9, 0  ;;  %v196_v13 = vperm.slane %v193_v9, 1 }
  0x20   :  { %156 = vmatpush.bf16.msra.mxu0 %v454_v26  ;;  %479 = vmatpush.bf16.msra.mxu3 %v454_v26 }
  0x21   :  { %301 = vmatpush.bf16.msra.mxu2 %v424_v28 }
  0x23   :  { %283 = vmatpush.bf16.msra.mxu1 %v412_v37 }
  0x24   :  { %157 = vmatpush.bf16.msra.mxu0 %v453_v29  ;;  %480 = vmatpush.bf16.msra.mxu3 %v453_v29 }
  0x25   :  { %302 = vmatpush.bf16.msra.mxu2 %v416_v39 }
  0x27   :  { %284 = vmatpush.bf16.msra.mxu1 %v404_v43 }
  0x28   :  { %158 = vmatpush.bf16.msra.mxu0 %v452_v30  ;;  %481 = vmatpush.bf16.msra.mxu3 %v452_v30 }
  0x29   :  { %303 = vmatpush.bf16.msra.mxu2 %v408_v45 }
  0x2b   :  { %285 = vmatpush.bf16.msra.mxu1 %v396_v49 }
  0x2c   :  { %159 = vmatpush.bf16.msra.mxu0 %v451_v31  ;;  %482 = vmatpush.bf16.msra.mxu3 %v451_v31 }
  0x2d   :  { %304 = vmatpush.bf16.msra.mxu2 %v400_v51 }
  0x2f   :  { %160 = vmatmul.bf16.vlgmr.msra.gmra.mxu0 %v449_v32  ;;  %165 = vmatmul.bf16.vlgmr.msra.gmra.mxu3 %v450_v33 }
  0x30   :  { %286 = vmatpush.bf16.msra.mxu1 %v388_v55 }
  0x31   :  { %305 = vmatpush.bf16.msra.mxu2 %v392_v57 }
  0xac   :  { %v161_v58 = vpop.f32.mrf.mxu0 }
  0xad   :  { %v162_v60 = vadd.f32 %v493_v59, %v161_v58 }
  0xaf   :  { %v171_v0 = vmax.f32 %v162_v60, 0.0 }
  0xb2   :  { %v166_v62 = vpop.f32.mrf.mxu3 }
  0xb3   :  { %v167_v4 = vadd.f32 %v493_v59, %v166_v62 }
  0xb4   :  { %v163_v61 = vpop.f32.mrf.mxu0 }
  0xb5   :  { %v164_v63 = vadd.f32 %v493_v59, %v163_v61  ;;  %v173_v6 = vmax.f32 %v167_v4, 0.0 }
  0xb7   :  { %v172_v1 = vmax.f32 %v164_v63, 0.0 }
  0xb9   :  { %v175_v2 = vpack.c.bf16 %v172_v1, %v171_v0 }
  0xba   :  { %v168_v3 = vpop.f32.mrf.mxu3 }
  0xbb   :  { %287 = vmatmul.bf16.vlgmr.msra.gmra.mxu1 %v175_v2  ;;  %306 = vmatmul.bf16.vlgmr.msra.gmra.mxu2 %v175_v2  ;;  %v169_v5 = vadd.f32 %v493_v59, %v168_v3 }
  0xbd   :  { %v174_v7 = vmax.f32 %v169_v5, 0.0 }
  0xbf   :  { %v176_v8 = vpack.c.bf16 %v174_v7, %v173_v6 }
  0xcb   :  { %292 = vmatmul.bf16.gmra.mxu1 %v176_v8  ;;  %311 = vmatmul.bf16.gmra.mxu2 %v176_v8 }
 0x138   :  { %v288_v11 = vpop.f32.mrf.mxu1 }
 0x139   :  { %v289_v12 = vadd.f32 %v288_v11, %v195_v10 }
 0x13b   :  { %317 = vst [vmem:[#allocation8] sm:$0xff] %v289_v12 }
 0x13e   :  { %v307_v14 = vpop.f32.mrf.mxu2 }
 0x13f   :  { %v308_v15 = vadd.f32 %v307_v14, %v196_v13 }
 0x140   :  { %v290_v16 = vpop.f32.mrf.mxu1 }
 0x141   :  { %318 = vst [vmem:[#allocation8 + $0x8] sm:$0xff] %v308_v15  ;;  %v291_v17 = vadd.f32 %v290_v16, %v195_v10 }
 0x143   :  { %319 = vst [vmem:[#allocation8 + $0x10] sm:$0xff] %v291_v17 }
 0x146   :  { %v309_v18 = vpop.f32.mrf.mxu2 }
 0x147   :  { %v310_v19 = vadd.f32 %v309_v18, %v196_v13 }
 0x148   :  { %v293_v20 = vpop.f32.mrf.mxu1 }
 0x149   :  { %320 = vst [vmem:[#allocation8 + $0x18] sm:$0xff] %v310_v19  ;;  %v294_v21 = vadd.f32 %v293_v20, %v195_v10 }
 0x14b   :  { %321 = vst [vmem:[#allocation8 + $0x20] sm:$0xff] %v294_v21 }
 0x14e   :  { %v312_v22 = vpop.f32.mrf.mxu2 }
 0x14f   :  { %v313_v23 = vadd.f32 %v312_v22, %v196_v13 }
 0x150   :  { %v295_v24 = vpop.f32.mrf.mxu1 }
 0x151   :  { %322 = vst [vmem:[#allocation8 + $0x28] sm:$0xff] %v313_v23  ;;  %v296_v25 = vadd.f32 %v295_v24, %v195_v10 }
 0x153   :  { %323 = vst [vmem:[#allocation8 + $0x30] sm:$0xff] %v296_v25 }
 0x156   :  { %v314_v26 = vpop.f32.mrf.mxu2 }
 0x157   :  { %v315_v27 = vadd.f32 %v314_v26, %v196_v13 }
 0x159   :  { %324 = vst [vmem:[#allocation8 + $0x38] sm:$0xff] %v315_v27 }
 0x15a   :  { %337 = dma.vmem_to_hbm [thread:$0]  %s330_s4, 1024, %s332_s15, [#allocation4], %s604_s16, %s604_s16, %s605_s17  }
 0x15b   :  { %594 = dma.done.wait [#allocation4], 1024  }
 0x15c   :  { %595 = vsyncadd [#allocation4], 4294966272 }
 0x15d   :  { %342 = vsyncpa [#allocation3], 1 }
 0x15e   :  { %343 = vsyncpa [#allocation6], 1 }
 0x15f   :  { %344 = vsyncpa [#allocation4], 1 }

</bundles_post_ra>
